<compile_context>
chip_gen: v6e
topology: v6e:2x2x1
jax: 0.10.0
libtpu: 0.0.40
codegen_flags: <defaults>
</compile_context>

<pallas_src>
import jax
import jax.numpy as jnp
from jax import lax
from jax.experimental import pallas as pl
from jax.experimental.pallas import tpu as pltpu

B, S, H, V = 2, 8, 32, 128   # batch, seq, hidden, vocab (toy shapes)
M = B * S                    # flattened rows for the full-logits matmul (8-aligned)
B_PAD = 8                    # sublane-pad last-position batch rows to one (8,128) tile


def attribution_forward_kernel(tgt_ref, x_ref, xlast_ref, w_ref, b_ref,
                               logits_ref, score_ref):
    """Logits projection (MXU, bf16 in / f32 acc) + probability step score."""
    w = w_ref[...]                               # [H, V]  bf16
    bias = b_ref[...]                            # [1, V]  f32 (read once, reused)

    # --- model forward: full-position logits (MXU, f32 accumulation) -------
    logits_ref[...] = bias + jnp.dot(
        x_ref[...], w, preferred_element_type=jnp.float32)           # [M, V] f32

    # --- attributed_fn == "probability" at the last generation step --------
    # Contiguous (B_PAD, H) last-position input avoids the stride-S sublane
    # slice through the XLU; the extra tiny dot stays on the otherwise-idle MXU.
    last = bias + jnp.dot(
        xlast_ref[...], w, preferred_element_type=jnp.float32)       # [B_PAD, V]

    m = jnp.max(last, axis=-1, keepdims=True)
    e = jnp.exp(last - m)                                            # EUP
    denom = jnp.sum(e, axis=-1, keepdims=True)                       # XLU reduce
    probs = e * pl.reciprocal(denom, approx=True)                    # EUP recip

    # Gather P[target] per row. target_ids are SMEM scalars -> scalar-broadcast
    # compares; one-hot compare+reduce is fine while V fits a single vreg.
    # TODO(synk): once V is tiled over a grid axis, switch to an online softmax
    # (running max/denom in VMEM scratch) + scalar-indexed gather per tile.
    col = lax.broadcasted_iota(jnp.int32, (B_PAD, V), 1)
    row = lax.broadcasted_iota(jnp.int32, (B_PAD, V), 0)
    onehot = jnp.zeros((B_PAD, V), jnp.float32)
    for b in range(B):                                               # B is static
        onehot = jnp.where((row == b) & (col == tgt_ref[b]), 1.0, onehot)

    score_col = jnp.sum(probs * onehot, axis=-1, keepdims=True)      # [B_PAD, 1]
    # Lane-dense (8,128) store: unmasked vst; wrapper reads column 0, rows :B.
    score_ref[...] = jnp.broadcast_to(score_col, (B_PAD, V))


def attribution_model_forward(input_ids, target_ids, vocab_emb, w, b, embed_scale):
    # glue: embedding lookup + embed_scale (embed_ids equivalent)
    # TODO(synk): at production S/H fuse this gather into the kernel via
    # PrefetchScalarGridSpec(num_scalar_prefetch=1) + pl.Element row-gather to
    # avoid the HBM round trip for the activations.
    embeds = jnp.take(vocab_emb, input_ids, axis=0) * embed_scale    # [B, S, H] f32

    # bf16 MXU inputs; f32 accumulation happens inside the kernel.
    x = embeds.reshape(M, H).astype(jnp.bfloat16)                    # [M, H]
    x_last = jnp.pad(embeds[:, -1, :],
                     ((0, B_PAD - B), (0, 0))).astype(jnp.bfloat16)  # [B_PAD, H]
    w_bf16 = w.astype(jnp.bfloat16)                                  # [H, V]
    tgt = target_ids.astype(jnp.int32)                               # [B] -> SMEM

    # TODO(synk): at real model sizes tile M over B*S ("parallel", uses v7x's
    # 2nd TensorCore), K over H ("arbitrary", f32 VMEM accumulator) and V over
    # the vocab (tile sized against 64 MiB VMEM on v7x / 128 MiB on v5e/v6e,
    # with vmem_limit_bytes raised accordingly).
    logits2d, score_slab = pl.pallas_call(
        attribution_forward_kernel,
        out_shape=(jax.ShapeDtypeStruct((M, V), jnp.float32),
                   jax.ShapeDtypeStruct((B_PAD, V), jnp.float32)),
        grid=(1,),
        in_specs=[pl.BlockSpec(memory_space=pltpu.MemorySpace.SMEM),  # target_ids
                  pl.BlockSpec((M, H), lambda i: (0, 0)),             # x
                  pl.BlockSpec((B_PAD, H), lambda i: (0, 0)),         # x_last
                  pl.BlockSpec((H, V), lambda i: (0, 0)),             # w (bf16)
                  pl.BlockSpec((1, V), lambda i: (0, 0))],            # bias (f32)
        out_specs=(pl.BlockSpec((M, V), lambda i: (0, 0)),
                   pl.BlockSpec((B_PAD, V), lambda i: (0, 0))),
        compiler_params=pltpu.CompilerParams(
            dimension_semantics=("arbitrary",)),
    )(tgt, x, x_last, w_bf16, b)

    return logits2d.reshape(B, S, V), score_slab[:B, 0]


def _reference(input_ids, target_ids, vocab_emb, w, b, embed_scale):
    embeds = jnp.take(vocab_emb, input_ids, axis=0) * embed_scale
    logits = jnp.einsum("bsh,hv->bsv", embeds.astype(jnp.float32), w) + b[0]
    probs = jax.nn.softmax(logits[:, -1, :], axis=-1)
    scores = probs[jnp.arange(B), target_ids]
    return logits, scores


if __name__ == "__main__":
    key = jax.random.PRNGKey(0)
    k_emb, k_w, k_b, k_ids, k_tgt = jax.random.split(key, 5)

    # deterministic synthetic parameters
    vocab_emb = jax.random.normal(k_emb, (V, H), jnp.float32) * 0.02
    w = jax.random.normal(k_w, (H, V), jnp.float32) * 0.05
    b = jax.random.normal(k_b, (1, V), jnp.float32) * 0.01
    embed_scale = jnp.float32(H) ** -0.5

    input_ids = jax.random.randint(k_ids, (B, S), 0, V, jnp.int32)
    target_ids = jax.random.randint(k_tgt, (B,), 0, V, jnp.int32)

    logits, scores = attribution_model_forward(
        input_ids, target_ids, vocab_emb, w, b, embed_scale)
    jax.block_until_ready((logits, scores))

    ref_logits, ref_scores = _reference(
        input_ids, target_ids, vocab_emb, w, b, embed_scale)
    # bf16 MXU inputs (f32 accumulation) + approx reciprocal -> slightly looser
    # tolerances than the pure-f32 version.
    assert jnp.allclose(logits, ref_logits, atol=1e-3, rtol=1e-2)
    assert jnp.allclose(scores, ref_scores, atol=1e-4, rtol=2e-2)

    # TODO(synk): tokenization / generation / attribution-method dispatch of
    # AttributionModel are host-side string/control logic with no kernel analog.
    print("KERNEL_OK")
</pallas_src>

<mosaic_0001>
module attributes {stable_mosaic.version = 11 : i64} {
  func.func @attribution_forward_kernel(%arg0: i32, %arg1: memref<2xi32, #tpu.memory_space<smem>>, %arg2: memref<16x32xbf16, #tpu.memory_space<vmem>>, %arg3: memref<8x32xbf16, #tpu.memory_space<vmem>>, %arg4: memref<32x128xbf16, #tpu.memory_space<vmem>>, %arg5: memref<1x128xf32, #tpu.memory_space<vmem>>, %arg6: memref<16x128xf32, #tpu.memory_space<vmem>>, %arg7: memref<8x128xf32, #tpu.memory_space<vmem>>) attributes {dimension_semantics = [#tpu.dimension_semantics<arbitrary>], iteration_bounds = array<i64: 1>, scalar_prefetch = 0 : i64, scratch_operands = 0 : i64, tpu.core_type = #tpu.core_type<tc>, window_params = [{transform_indices = @transform_0, window_bounds = array<i64: 2>}, {pipeline_mode = #tpu.pipeline_mode<synchronous>, transform_indices = @transform_1, window_bounds = array<i64: 16, 32>}, {pipeline_mode = #tpu.pipeline_mode<synchronous>, transform_indices = @transform_2, window_bounds = array<i64: 8, 32>}, {pipeline_mode = #tpu.pipeline_mode<synchronous>, transform_indices = @transform_3, window_bounds = array<i64: 32, 128>}, {pipeline_mode = #tpu.pipeline_mode<synchronous>, transform_indices = @transform_4, window_bounds = array<i64: 1, 128>}, {pipeline_mode = #tpu.pipeline_mode<synchronous>, transform_indices = @transform_5, window_bounds = array<i64: 16, 128>}, {pipeline_mode = #tpu.pipeline_mode<synchronous>, transform_indices = @transform_6, window_bounds = array<i64: 8, 128>}]} {
    %c0 = arith.constant 0 : index
    %c0_0 = arith.constant 0 : index
    %0 = vector.load %arg4[%c0, %c0_0] : memref<32x128xbf16, #tpu.memory_space<vmem>>, vector<32x128xbf16>
    %c0_1 = arith.constant 0 : index
    %c0_2 = arith.constant 0 : index
    %1 = vector.load %arg5[%c0_1, %c0_2] : memref<1x128xf32, #tpu.memory_space<vmem>>, vector<1x128xf32>
    %c0_3 = arith.constant 0 : index
    %c0_4 = arith.constant 0 : index
    %2 = vector.load %arg2[%c0_3, %c0_4] : memref<16x32xbf16, #tpu.memory_space<vmem>>, vector<16x32xbf16>
    %cst = arith.constant dense<0.000000e+00> : vector<16x128xf32>
    %3 = tpu.matmul %2, %0, %cst {dimension_numbers = #tpu.dot_dimension_numbers<[1], [0], [0], [1], [0, 0, 1, 1], [], []>} : vector<16x32xbf16>, vector<32x128xbf16>, vector<16x128xf32> -> vector<16x128xf32>
    %4 = vector.broadcast %1 : vector<1x128xf32> to vector<16x128xf32>
    %5 = arith.addf %4, %3 : vector<16x128xf32>
    %c0_5 = arith.constant 0 : index
    %c0_6 = arith.constant 0 : index
    %6 = vector.load %arg6[%c0_5, %c0_6] : memref<16x128xf32, #tpu.memory_space<vmem>>, vector<16x128xf32>
    tpu.vector_store %arg6[%c0_5, %c0_6], %5 {strides = array<i32>} : memref<16x128xf32, #tpu.memory_space<vmem>>, vector<16x128xf32>,
    %c0_7 = arith.constant 0 : index
    %c0_8 = arith.constant 0 : index
    %7 = vector.load %arg3[%c0_7, %c0_8] : memref<8x32xbf16, #tpu.memory_space<vmem>>, vector<8x32xbf16>
    %cst_9 = arith.constant dense<0.000000e+00> : vector<8x128xf32>
    %8 = tpu.matmul %7, %0, %cst_9 {dimension_numbers = #tpu.dot_dimension_numbers<[1], [0], [0], [1], [0, 0, 1, 1], [], []>} : vector<8x32xbf16>, vector<32x128xbf16>, vector<8x128xf32> -> vector<8x128xf32>
    %9 = vector.broadcast %1 : vector<1x128xf32> to vector<8x128xf32>
    %10 = arith.addf %9, %8 : vector<8x128xf32>
    %cst_10 = arith.constant dense<0xFF800000> : vector<8xf32>
    %11 = vector.multi_reduction <maximumf>, %10, %cst_10 [1] : vector<8x128xf32> to vector<8xf32>
    %12 = vector.shape_cast %11 : vector<8xf32> to vector<8x1xf32>
    %13 = vector.broadcast %12 : vector<8x1xf32> to vector<8x128xf32>
    %14 = arith.subf %10, %13 : vector<8x128xf32>
    %15 = math.exp %14 : vector<8x128xf32>
    %cst_11 = arith.constant dense<0.000000e+00> : vector<8xf32>
    %16 = vector.multi_reduction <add>, %15, %cst_11 [1] : vector<8x128xf32> to vector<8xf32>
    %17 = vector.shape_cast %16 : vector<8xf32> to vector<8x1xf32>
    %18 = tpu.reciprocal %17 {approx = true} : vector<8x1xf32> -> vector<8x1xf32>
    %19 = vector.broadcast %18 : vector<8x1xf32> to vector<8x128xf32>
    %20 = arith.mulf %15, %19 : vector<8x128xf32>
    %21 = tpu.iota {dimensions = array<i32: 1>} : vector<8x128xi32>
    %22 = tpu.iota {dimensions = array<i32: 0>} : vector<8x128xi32>
    %cst_12 = arith.constant 0.000000e+00 : f32
    %23 = vector.broadcast %cst_12 : f32 to vector<8x128xf32>
    %c0_i32 = arith.constant 0 : i32
    %24 = vector.broadcast %c0_i32 : i32 to vector<8x128xi32>
    %25 = arith.cmpi eq, %22, %24 : vector<8x128xi32>
    %c0_13 = arith.constant 0 : index
    %26 = memref.load %arg1[%c0_13] : memref<2xi32, #tpu.memory_space<smem>>
    %27 = vector.broadcast %26 : i32 to vector<8x128xi32>
    %28 = arith.cmpi eq, %21, %27 : vector<8x128xi32>
    %29 = arith.andi %25, %28 : vector<8x128xi1>
    %cst_14 = arith.constant 1.000000e+00 : f32
    %30 = vector.broadcast %cst_14 : f32 to vector<8x128xf32>
    %31 = arith.select %29, %30, %23 : vector<8x128xi1>, vector<8x128xf32>
    %c1_i32 = arith.constant 1 : i32
    %32 = vector.broadcast %c1_i32 : i32 to vector<8x128xi32>
    %33 = arith.cmpi eq, %22, %32 : vector<8x128xi32>
    %c1 = arith.constant 1 : index
    %34 = memref.load %arg1[%c1] : memref<2xi32, #tpu.memory_space<smem>>
    %35 = vector.broadcast %34 : i32 to vector<8x128xi32>
    %36 = arith.cmpi eq, %21, %35 : vector<8x128xi32>
    %37 = arith.andi %33, %36 : vector<8x128xi1>
    %cst_15 = arith.constant 1.000000e+00 : f32
    %38 = vector.broadcast %cst_15 : f32 to vector<8x128xf32>
    %39 = arith.select %37, %38, %31 : vector<8x128xi1>, vector<8x128xf32>
    %40 = arith.mulf %20, %39 : vector<8x128xf32>
    %cst_16 = arith.constant dense<0.000000e+00> : vector<8xf32>
    %41 = vector.multi_reduction <add>, %40, %cst_16 [1] : vector<8x128xf32> to vector<8xf32>
    %42 = vector.shape_cast %41 : vector<8xf32> to vector<8x1xf32>
    %43 = vector.shape_cast %42 : vector<8x1xf32> to vector<8x1xf32>
    %44 = vector.broadcast %43 : vector<8x1xf32> to vector<8x128xf32>
    %c0_17 = arith.constant 0 : index
    %c0_18 = arith.constant 0 : index
    %45 = vector.load %arg7[%c0_17, %c0_18] : memref<8x128xf32, #tpu.memory_space<vmem>>, vector<8x128xf32>
    tpu.vector_store %arg7[%c0_17, %c0_18], %44 {strides = array<i32>} : memref<8x128xf32, #tpu.memory_space<vmem>>, vector<8x128xf32>,
    return
  }
  func.func @transform_0(%arg0: i32) -> i32 {
    %c0_i32 = arith.constant 0 : i32
    %c0_i32_0 = arith.constant 0 : i32
    return %c0_i32 : i32
  }
  func.func @transform_1(%arg0: i32) -> (i32, i32) {
    %c0_i32 = arith.constant 0 : i32
    %c0_i32_0 = arith.constant 0 : i32
    %c0_i32_1 = arith.constant 0 : i32
    return %c0_i32, %c0_i32_0 : i32, i32
  }
  func.func @transform_2(%arg0: i32) -> (i32, i32) {
    %c0_i32 = arith.constant 0 : i32
    %c0_i32_0 = arith.constant 0 : i32
    %c0_i32_1 = arith.constant 0 : i32
    return %c0_i32, %c0_i32_0 : i32, i32
  }
  func.func @transform_3(%arg0: i32) -> (i32, i32) {
    %c0_i32 = arith.constant 0 : i32
    %c0_i32_0 = arith.constant 0 : i32
    %c0_i32_1 = arith.constant 0 : i32
    return %c0_i32, %c0_i32_0 : i32, i32
  }
  func.func @transform_4(%arg0: i32) -> (i32, i32) {
    %c0_i32 = arith.constant 0 : i32
    %c0_i32_0 = arith.constant 0 : i32
    %c0_i32_1 = arith.constant 0 : i32
    return %c0_i32, %c0_i32_0 : i32, i32
  }
  func.func @transform_5(%arg0: i32) -> (i32, i32) {
    %c0_i32 = arith.constant 0 : i32
    %c0_i32_0 = arith.constant 0 : i32
    %c0_i32_1 = arith.constant 0 : i32
    return %c0_i32, %c0_i32_0 : i32, i32
  }
  func.func @transform_6(%arg0: i32) -> (i32, i32) {
    %c0_i32 = arith.constant 0 : i32
    %c0_i32_0 = arith.constant 0 : i32
    %c0_i32_1 = arith.constant 0 : i32
    return %c0_i32, %c0_i32_0 : i32, i32
  }
}

</mosaic_0001>

<bundles_post_ra>
// kernel: tpu_custom_call.1
= control target key start
LH: loop header
LB: loop body
LE: loop exit
PB: predicated region body
PF: predicated region fallthrough
CT: control target
= control target key end

     0   :  { %12 = vsyncpa [#allocation5], 0  ;;  %s495_s0 = inlined_call_operand.hbm [shape: s32[2], index: 0, kind: input, shape index: {}]   ;;  %s496_s1 = inlined_call_operand.hbm [shape: bf16[16,32], index: 1, kind: input, shape index: {}]   ;;  %s497_s2 = inlined_call_operand.hbm [shape: bf16[8,32], index: 2, kind: input, shape index: {}]   ;;  %s498_s3 = inlined_call_operand.hbm [shape: bf16[32,128], index: 3, kind: input, shape index: {}]   ;;  %s499_s4 = inlined_call_operand.vmem [shape: f32[1,128], index: 4, kind: input, shape index: {}]   ;;  %s500_s5 = inlined_call_operand.hbm [shape: f32[16,128], index: 5, kind: output, shape index: {0}]   ;;  %s501_s6 = inlined_call_operand.hbm [shape: f32[8,128], index: 6, kind: output, shape index: {1}]  }
   0x1   :  { %13 = vsyncpa [#allocation3], 0 }
   0x2   :  { %14 = vsyncpa [#allocation8], 0 }
   0x3   :  { %15 = vsyncpa [#allocation4], 0 }
   0x4   :  { %16 = vsyncpa [#allocation12], 0  ;;  %s427_s21 = smov [#allocation7]   ;;  %s428_s23 = smov [#allocation6]  }
   0x5   :  { %s43_s22 = sshll.u32 %s427_s21, 4  ;;  %s30_s24 = sshll.u32 %s428_s23, 4  ;;  %s44_s22 = int_to_ptr.vmem [resolvable:$true] %s43_s22  ;;  %s31_s24 = int_to_ptr.vmem [resolvable:$true] %s30_s24 }
   0x6   :  { %s317_s25 = scalar_lea.vmem %s44_s22, 64  ;;  %p322_p1 = scmp.lt.s32.totalorder %s44_s22, %s44_s22 }
   0x7   :  { %p318_p0 = scmp.ne.s32.totalorder %s44_s22, %s317_s25  ;;  %p323_p2 = scmp.lt.s32.totalorder %s317_s25, %s317_s25 }
   0x9   :  { %p324_p3 = por %p323_p2, %p322_p1 }
   0xb   :  { %p325_p4 = pnand %p324_p3, %p318_p0 }
   0xd   :  { %328 = shalt.err (!%p325_p4)
}
   0xe   :  { %46 = dma.hbm_to_vmem [thread:$0]  %s497_s2, 64, %s44_s22, [#allocation8]  }
   0xf   :  { %s429_s28 = smov [#allocation2]   ;;  %s345_s7 = scalar_lea.vmem %s31_s24, 128 }
  0x10   :  { %24 = dma.hbm_to_smem %s495_s0, 16, %s429_s28, [#allocation5]  }
  0x11   :  { %p346_p5 = scmp.ne.s32.totalorder %s31_s24, %s345_s7  ;;  %p350_p6 = scmp.lt.s32.totalorder %s31_s24, %s31_s24 }
  0x12   :  { %p351_p7 = scmp.lt.s32.totalorder %s345_s7, %s345_s7 }
  0x14   :  { %p352_p8 = por %p351_p7, %p350_p6 }
  0x16   :  { %p353_p9 = pnand %p352_p8, %p346_p5 }
  0x18   :  { %356 = shalt.err (!%p353_p9)
}
  0x19   :  { %s430_s8 = smov 64   ;;  %s431_s9 = smov 4  }
  0x1a   :  { %36 = dma.hbm_to_vmem [thread:$0]  %s496_s1, 128, %s31_s24, [#allocation3], %s430_s8, %s430_s8, %s431_s9  }
  0x1b   :  { %s432_s2 = smov [#allocation9]  }
  0x1c   :  { %s52_s12 = sshll.u32 %s432_s2, 4  ;;  %s53_s12 = int_to_ptr.vmem [resolvable:$true] %s52_s12 }
  0x1d   :  { %s365_s13 = scalar_lea.vmem %s53_s12, 256  ;;  %p370_p11 = scmp.lt.s32.totalorder %s53_s12, %s53_s12 }
  0x1e   :  { %p366_p10 = scmp.ne.s32.totalorder %s53_s12, %s365_s13  ;;  %p371_p12 = scmp.lt.s32.totalorder %s365_s13, %s365_s13 }
  0x20   :  { %p372_p13 = por %p371_p12, %p370_p11 }
  0x22   :  { %p373_p0 = pnand %p372_p13, %p366_p10 }
  0x24   :  { %376 = shalt.err (!%p373_p0)
}
  0x25   :  { %58 = dma.hbm_to_vmem [thread:$0]  %s498_s3, 256, %s53_s12, [#allocation8], %s430_s8, %s430_s8, %s431_s9  }
  0x26   :  { %417 = dma.done.wait [#allocation5], 16  }
  0x27   :  { %418 = vsyncadd [#allocation5], 4294967280 }
  0x28   :  { %419 = dma.done.wait [#allocation3], 128  }
  0x29   :  { %420 = vsyncadd [#allocation3], 4294967168 }
  0x2a   :  { %421 = dma.done.wait [#allocation8], 320  }
  0x2b   :  { %422 = vsyncadd [#allocation8], 4294966976 }
  0x2c   :  { %73 = sfence }
  0x2d   :  { %v302_v0 = vld [vmem:[#allocation9 + $0x8] sm:$0xff]   ;;  %v433_v1 = vmov 0.0   ;;  %v303_v2 = vld [vmem:[#allocation9] sm:$0xff]   ;;  %vm434_vm0 = vmmov 0   ;;  %vm99_vm1 = vcmask 261120   ;;  %v304_v10 = vld [vmem:[#allocation6] sm:$0xff]   ;;  %v208_v21 = vlaneseq }
  0x2e   :  { %282 = vmatprep.subr.bf16.mxu1 %v433_v1  ;;  %274 = vmatprep.subr.bf16.mxu0 %v433_v1  ;;  %v154_v3 = vld [vmem:[#allocation7] sm:$0xf]  ;;  %v265_v4 = vld [vmem:[%s499_s4] ss:$0 sm:$0xff]  ;;  %s213_s4 = sld [smem:[#allocation2]]  ;;  %s435_s16 = smov [#allocation10]  }
  0x2f   :  { %283 = vmatpush3.bf16.msra.mxu1 %v302_v0  ;;  %286 = vmatprep.mubr.msk.bf16.mxu1 %vm434_vm0, %v433_v1  ;;  %s267_s15 = sld [smem:[#allocation2 + $0x1]]  ;;  %v209_v23 = vand.u32 127, %v208_v21  ;;  %v211_v24 = vshrl.u32 %v208_v21, 7  ;;  %s233_s17 = sshll.u32 %s435_s16, 4  ;;  %s234_s17 = int_to_ptr.vmem [resolvable:$true] %s233_s17 }
  0x30   :  { %284 = vmatprep.subr.bf16.mxu1 %v433_v1  ;;  %275 = vmatpush3.bf16.msra.mxu0 %v302_v0  ;;  %s377_s18 = scalar_lea.vmem %s234_s17, 256  ;;  %p382_p2 = scmp.lt.s32.totalorder %s234_s17, %s234_s17 }
  0x31   :  { %276 = vmatprep.subr.bf16.mxu0 %v433_v1  ;;  %278 = vmatprep.mubr.msk.bf16.mxu0 %vm434_vm0, %v433_v1  ;;  %vm212_vm2 = vcmp.eq.s32.totalorder %v211_v24, 0  ;;  %vm218_vm5 = vcmp.eq.s32.totalorder %v211_v24, 1  ;;  %p378_p1 = scmp.ne.s32.totalorder %s234_s17, %s377_s18  ;;  %p383_p3 = scmp.lt.s32.totalorder %s377_s18, %s377_s18 }
  0x33   :  { %285 = vmatpush3.bf16.msra.mxu1 %v303_v2  ;;  %p384_p4 = por %p383_p3, %p382_p2 }
  0x34   :  { %277 = vmatpush3.bf16.msra.mxu0 %v303_v2  ;;  %v214_v25 = vstv %s213_s4 }
  0x35   :  { %vm215_vm3 = vcmp.eq.s32.totalorder %v209_v23, %v214_v25  ;;  %v220_v26 = vstv %s267_s15  ;;  %p385_p5 = pnand %p384_p4, %p378_p1 }
  0x36   :  { %287 = vmatmul.mubr.msk.bf16.vlgmr.msra.gmra.mxu1 %vm99_vm1, %v154_v3  ;;  %vm216_vm4 = vmand %vm212_vm2, %vm215_vm3  ;;  %vm221_vm6 = vcmp.eq.s32.totalorder %v209_v23, %v220_v26 }
  0x37   :  { %279 = vmatmul.mubr.msk.bf16.vlgmr.msra.gmra.mxu0 %vm99_vm1, %v304_v10  ;;  %v217_v27 = vsel %vm216_vm4, 1.0, %v433_v1  ;;  %vm222_vm7 = vmand %vm218_vm5, %vm221_vm6 }
  0x38   :  { %v223_v29 = vsel %vm222_vm7, 1.0, %v217_v27 }
  0xf6   :  { %v192_v5 = vpop.f32.mrf.mxu1 }
  0xf7   :  { %v198_v6 = vadd.f32 %v265_v4, %v192_v5  ;;  %v137_v15 = vpop.f32.mrf.mxu0 }
  0xf8   :  { %v288_v7 = vpop.f32.mrf.mxu1  ;;  %v150_v16 = vadd.f32 %v265_v4, %v137_v15 }
  0xf9   :  { %199 = vmax.xlane.f32.xlu0 %v198_v6  ;;  %v280_v17 = vpop.f32.mrf.mxu0 }
  0xfa   :  { %v195_v8 = vpop.f32.mrf.mxu1  ;;  %152 = vst [vmem:[#allocation10] sm:$0xff] %v150_v16 }
  0xfb   :  { %v140_v18 = vpop.f32.mrf.mxu0 }
  0xfc   :  { %v289_v9 = vpop.f32.mrf.mxu1  ;;  %v151_v19 = vadd.f32 %v265_v4, %v140_v18 }
  0xfd   :  { %v281_v20 = vpop.f32.mrf.mxu0 }
  0xfe   :  { %153 = vst [vmem:[#allocation10 + $0x8] sm:$0xff] %v151_v19 }
 0x182   :  { %v200_v11 = vpop.xlane.xlu0 %199 }
 0x183   :  { %v201_v12 = vsub.f32 %v198_v6, %v200_v11 }
 0x185   :  { %v202_v13 = vmul.f32 1.442695, %v201_v12 }
 0x187   :  { %305 = vpow2.f32 %v202_v13 }
 0x194   :  { %v306_v14 = vpop.eup %305 }
 0x195   :  { %204 = vadd.xlane.f32.xlu0 %v306_v14 }
 0x21e   :  { %v205_v22 = vpop.xlane.xlu0 %204 }
 0x21f   :  { %307 = vrcp.f32 %v205_v22 }
 0x22c   :  { %v308_v28 = vpop.eup %307 }
 0x22d   :  { %v207_v30 = vmul.f32 %v308_v28, %v306_v14 }
 0x22f   :  { %v224_v31 = vmul.f32 %v223_v29, %v207_v30 }
 0x231   :  { %225 = vadd.xlane.f32.xlu1 %v224_v31 }
 0x232   :  { %388 = shalt.err (!%p385_p5)
}
 0x233   :  { %s436_s19 = smov 128   ;;  %s437_s20 = smov 8  }
 0x234   :  { %239 = dma.vmem_to_hbm [thread:$0]  %s234_s17, 256, %s500_s5, [#allocation4], %s436_s19, %s436_s19, %s437_s20  }
 0x235   :  { %s438_s23 = smov [#allocation11]  }
 0x236   :  { %s246_s24 = sshll.u32 %s438_s23, 4  ;;  %s247_s24 = int_to_ptr.vmem [resolvable:$true] %s246_s24 }
 0x237   :  { %s397_s25 = scalar_lea.vmem %s247_s24, 128  ;;  %p402_p7 = scmp.lt.s32.totalorder %s247_s24, %s247_s24 }
 0x238   :  { %p398_p6 = scmp.ne.s32.totalorder %s247_s24, %s397_s25  ;;  %p403_p8 = scmp.lt.s32.totalorder %s397_s25, %s397_s25 }
 0x23a   :  { %p404_p9 = por %p403_p8, %p402_p7 }
 0x23c   :  { %p405_p10 = pnand %p404_p9, %p398_p6 }
 0x2ba   :  { %v226_v32 = vpop.xlane.xlu1 %225 }
 0x2bb   :  { %227 = vst [vmem:[#allocation11] sm:$0xff] %v226_v32 }
 0x2bc   :  { %408 = shalt.err (!%p405_p10)
}
 0x2bd   :  { %249 = dma.vmem_to_hbm [thread:$0]  %s247_s24, 128, %s501_s6, [#allocation12]  }
 0x2be   :  { %423 = dma.done.wait [#allocation4], 256  }
 0x2bf   :  { %424 = vsyncadd [#allocation4], 4294967040 }
 0x2c0   :  { %425 = dma.done.wait [#allocation12], 128  }
 0x2c1   :  { %426 = vsyncadd [#allocation12], 4294967168 }
 0x2c2   :  { %256 = vsyncpa [#allocation3], 1 }
 0x2c3   :  { %257 = vsyncpa [#allocation8], 1 }
 0x2c4   :  { %258 = vsyncpa [#allocation4], 1 }
 0x2c5   :  { %259 = vsyncpa [#allocation12], 1 }
 0x2c6   :  { %260 = vsyncpa [#allocation5], 1 }

</bundles_post_ra>
